<compile_context>
chip_gen: v7x
topology: tpu7x:2x2x1
jax: 0.10.0
libtpu: 0.0.40
codegen_flags: <defaults>
</compile_context>

<pallas_src>
import functools

import jax
import jax.numpy as jnp
from jax.experimental import pallas as pl
from jax.experimental.pallas import tpu as pltpu


def _supcon_kernel(feat_ref, cent_ref, lab_ref, out_ref, *, batch_size, tb):
    """One grid step: per-block partial sum of (log_denominator - numerator_logit).

    Layouts (class axis on sublanes, batch axis on lanes -> lane-dense softmax):
      feat_ref : (TB, D)    streamed feature tile
      cent_ref : (C,  D)    resident, rows already L2-normalized
      lab_ref  : (1, 1, TB) int32 labels for this tile (lane-dense)
      out_ref  : (1, 1, 128) lane-dense partial-sum block
    """
    feat = feat_ref[...]                       # (TB, D)
    cent = cent_ref[...]                       # (C, D)
    labels = lab_ref[0]                        # (1, TB) int32

    # logits[j, i] = c_j . f_i   (MXU, f32 accumulation) -> (C, TB)
    logits = jax.lax.dot_general(
        cent, feat,
        dimension_numbers=(((1,), (1,)), ((), ())),
        preferred_element_type=jnp.float32)

    n_cls, n_rows = logits.shape
    class_ids = jax.lax.broadcasted_iota(jnp.int32, (n_cls, n_rows), 0)
    onehot = (labels == class_ids).astype(jnp.float32)              # (C, TB)

    # numerator logit of each sample = logit at its label
    num_logit = jnp.sum(logits * onehot, axis=0, keepdims=True)     # (1, TB)

    # max-shifted log-sum-exp over classes: mathematically identical, numerically safe
    m = jnp.max(logits, axis=0, keepdims=True)                      # (1, TB)
    log_denom = m + jnp.log(jnp.sum(jnp.exp(logits - m), axis=0, keepdims=True))

    per_row = log_denom - num_logit                                 # (1, TB)

    # mask out ragged / out-of-bounds rows of the final block (select: no NaN leak)
    row_ids = pl.program_id(0) * tb + jax.lax.broadcasted_iota(
        jnp.int32, (1, n_rows), 1)
    per_row = jnp.where(row_ids < batch_size, per_row, 0.0)

    out_ref[...] = jnp.full(out_ref.shape, jnp.sum(per_row), dtype=out_ref.dtype)


def _round_up(x, m):
    return ((x + m - 1) // m) * m


def _vmem_budget():
    """(target feature-tile bytes, scoped-VMEM cap bytes), generation-aware."""
    try:
        kind = jax.devices()[0].device_kind.lower()
    except Exception:  # pragma: no cover - CPU / interpret fallback
        kind = ""
    if ("v6" in kind) or ("v5" in kind) or ("v4" in kind):
        # 128-MiB-physical-VMEM parts: big tiles, generous scoped limit.
        return 16 << 20, 96 << 20
    # Conservative default; also right for 64-MiB-VMEM (v7x-class) parts.
    return 12 << 20, 48 << 20


def _choose_tiling(batch, dim, n_cls, itemsize, tile_bytes, vmem_cap):
    """Pick rows-per-tile TB and grid size G (ragged last block allowed, masked)."""
    c_pad = max(8, _round_up(n_cls, 8))
    d_lane = _round_up(dim, 128)
    # Per-sample VMEM footprint: double-buffered feature row + padded label lane
    # + live (C_pad, TB) f32 temporaries (logits / onehot / exp / reductions).
    per_row = 2 * dim * itemsize + 2 * 8 * 4 + 8 * c_pad * 4
    fixed = 2 * c_pad * d_lane * 4 + 2 * 8 * 128 * 4 + (2 << 20)
    tb_vmem = max(8, (vmem_cap - fixed) // max(per_row, 1))
    tb_target = max(8, tile_bytes // max(dim * itemsize, 1))
    tb_max = max(8, (min(tb_vmem, tb_target) // 8) * 8)

    if batch <= tb_max:
        if batch >= 256:
            # Keep the grid splittable across 2 TensorCores (megacore on v7x-class).
            tb = _round_up(-(-batch // 2), 8)
        else:
            tb = batch            # single exact block; sublane dim == full array dim
    else:
        g0 = -(-batch // tb_max)
        tb = _round_up(-(-batch // g0), 8)
    g = max(1, -(-batch // tb))
    return tb, g, c_pad, d_lane


def supcon_loss_new(features, labels, center_list):
    """JAX wrapper matching SupConLoss_new.forward.

    features   : (B, D) float32 or bfloat16
    labels     : (B,)   int
    center_list: sequence of C arrays, each (D,)
    returns    : scalar float32 loss
    """
    features = jnp.asarray(features)
    compute_dtype = jnp.bfloat16 if features.dtype == jnp.bfloat16 else jnp.float32
    features = features.astype(compute_dtype)
    labels = jnp.asarray(labels, jnp.int32)

    # Stack centers to (C, D) and L2-normalize each center ONCE in XLA (hoisted
    # out of the kernel so it is never redone per grid step).
    center = jnp.stack([jnp.asarray(c, jnp.float32) for c in center_list], axis=0)
    center = center / jnp.maximum(
        jnp.linalg.norm(center, axis=1, keepdims=True), 1e-12)
    center = center.astype(compute_dtype)

    B, D = features.shape
    C = center.shape[0]
    itemsize = jnp.dtype(compute_dtype).itemsize

    tile_bytes, vmem_cap = _vmem_budget()
    TB, G, c_pad, d_lane = _choose_tiling(B, D, C, itemsize, tile_bytes, vmem_cap)

    # Labels only (tiny) are padded + reshaped to lane-dense (G, 1, TB) blocks;
    # features stream UNPADDED (ragged final block is masked in-kernel).
    lab_pad = G * TB - B
    labels_pal = labels if lab_pad == 0 else jnp.pad(labels, (0, lab_pad))
    labels_pal = labels_pal.reshape(G, 1, TB)

    # VMEM accounting with lane/sublane padding + live (C_pad, TB) temporaries.
    needed = (2 * TB * D * itemsize          # double-buffered feature tiles
              + 2 * 8 * TB * 4               # label tiles (sublane-padded)
              + 2 * c_pad * d_lane * 4       # centers (conservatively x2)
              + 2 * 8 * 128 * 4              # output tiles
              + 8 * c_pad * TB * 4           # softmax temporaries
              + (2 << 20))                   # compiler slack
    vmem_limit = int(min(max(needed, 16 << 20), vmem_cap))

    kernel = functools.partial(_supcon_kernel, batch_size=B, tb=TB)

    partials = pl.pallas_call(
        kernel,
        out_shape=jax.ShapeDtypeStruct((G, 1, 128), jnp.float32),
        grid=(G,),
        in_specs=[
            pl.BlockSpec((TB, D), lambda i: (i, 0)),        # features: streamed tiles
            pl.BlockSpec((C, D), lambda i: (0, 0)),         # centers: resident
            pl.BlockSpec((1, 1, TB), lambda i: (i, 0, 0)),  # labels: lane-dense
        ],
        out_specs=pl.BlockSpec((1, 1, 128), lambda i: (i, 0, 0)),
        compiler_params=pltpu.CompilerParams(
            dimension_semantics=("parallel",),
            vmem_limit_bytes=vmem_limit,
        ),
    )(features, center, labels_pal)

    # Final reduction + mean over the TRUE batch size in the wrapper.
    return jnp.sum(partials[:, 0, 0]) / jnp.float32(B)


def _reference_jax(features, labels, center_list):
    """Pure-JAX reference mirroring the PyTorch per-sample loop."""
    features = jnp.asarray(features, jnp.float32)
    center = jnp.stack([jnp.asarray(c, jnp.float32) for c in center_list], axis=-1)
    center = center / jnp.maximum(jnp.linalg.norm(center, axis=0, keepdims=True), 1e-12)
    logits = features @ center                                    # (B, C)
    num = jnp.exp(logits[jnp.arange(features.shape[0]), labels])
    den = jnp.sum(jnp.exp(logits), axis=1)
    return jnp.mean(-jnp.log(num / den))


if __name__ == "__main__":
    key = jax.random.PRNGKey(0)

    # Small case consistent with the module: batch=2, feature dim=32, 4 classes.
    B, D, C = 2, 32, 4
    k1, k2, k3 = jax.random.split(key, 3)
    features = jax.random.normal(k1, (B, D), dtype=jnp.float32)
    labels = jax.random.randint(k2, (B,), 0, C, dtype=jnp.int32)
    center_list = [jax.random.normal(jax.random.fold_in(k3, i), (D,), dtype=jnp.float32)
                   for i in range(C)]

    loss = supcon_loss_new(features, labels, center_list)
    jax.block_until_ready(loss)
    ref = _reference_jax(features, labels, center_list)
    assert jnp.allclose(loss, ref, rtol=1e-5, atol=1e-5), (loss, ref)

    # Second case: multi-block grid, unpadded features, ragged final block masking.
    B2, D2, C2 = 300, 128, 16
    k4, k5, k6 = jax.random.split(jax.random.fold_in(key, 7), 3)
    features2 = jax.random.normal(k4, (B2, D2), dtype=jnp.float32)
    labels2 = jax.random.randint(k5, (B2,), 0, C2, dtype=jnp.int32)
    center_list2 = [jax.random.normal(jax.random.fold_in(k6, i), (D2,), dtype=jnp.float32)
                    for i in range(C2)]

    loss2 = supcon_loss_new(features2, labels2, center_list2)
    jax.block_until_ready(loss2)
    ref2 = _reference_jax(features2, labels2, center_list2)
    assert jnp.allclose(loss2, ref2, rtol=1e-5, atol=1e-5), (loss2, ref2)

    print("KERNEL_OK")
</pallas_src>

<mosaic_0001>
module attributes {stable_mosaic.version = 11 : i64} {
  func.func @_supcon_kernel(%arg0: i32, %arg1: memref<2x32xf32, #tpu.memory_space<vmem>>, %arg2: memref<4x32xf32, #tpu.memory_space<vmem>>, %arg3: memref<1x1x2xi32, #tpu.memory_space<vmem>>, %arg4: memref<1x1x128xf32, #tpu.memory_space<vmem>>) attributes {dimension_semantics = [#tpu.dimension_semantics<parallel>], iteration_bounds = array<i64: 1>, scalar_prefetch = 0 : i64, scratch_operands = 0 : i64, tpu.core_type = #tpu.core_type<tc>, window_params = [{transform_indices = @transform_0, window_bounds = array<i64: 2, 32>}, {pipeline_mode = #tpu.pipeline_mode<synchronous>, transform_indices = @transform_1, window_bounds = array<i64: 4, 32>}, {transform_indices = @transform_2, window_bounds = array<i64: 1, 1, 2>}, {transform_indices = @transform_3, window_bounds = array<i64: 1, 1, 128>}]} {
    %c0 = arith.constant 0 : index
    %c0_0 = arith.constant 0 : index
    %0 = vector.load %arg1[%c0, %c0_0] : memref<2x32xf32, #tpu.memory_space<vmem>>, vector<2x32xf32>
    %c0_1 = arith.constant 0 : index
    %c0_2 = arith.constant 0 : index
    %1 = vector.load %arg2[%c0_1, %c0_2] : memref<4x32xf32, #tpu.memory_space<vmem>>, vector<4x32xf32>
    %c0_3 = arith.constant 0 : index
    %c0_4 = arith.constant 0 : index
    %c0_5 = arith.constant 0 : index
    %2 = vector.load %arg3[%c0_3, %c0_4, %c0_5] : memref<1x1x2xi32, #tpu.memory_space<vmem>>, vector<1x1x2xi32>
    %3 = vector.shape_cast %2 : vector<1x1x2xi32> to vector<1x2xi32>
    %cst = arith.constant dense<0.000000e+00> : vector<4x2xf32>
    %4 = tpu.matmul %1, %0, %cst {dimension_numbers = #tpu.dot_dimension_numbers<[1], [1], [0], [0], [0, 0, 1, 0], [], []>} : vector<4x32xf32>, vector<2x32xf32>, vector<4x2xf32> -> vector<4x2xf32>
    %5 = tpu.iota {dimensions = array<i32: 0>} : vector<4x2xi32>
    %6 = vector.broadcast %3 : vector<1x2xi32> to vector<4x2xi32>
    %7 = arith.cmpi eq, %6, %5 : vector<4x2xi32>
    %8 = arith.extui %7 : vector<4x2xi1> to vector<4x2xi32>
    %9 = arith.sitofp %8 : vector<4x2xi32> to vector<4x2xf32>
    %10 = arith.mulf %4, %9 : vector<4x2xf32>
    %cst_6 = arith.constant dense<0.000000e+00> : vector<2xf32>
    %11 = vector.multi_reduction <add>, %10, %cst_6 [0] : vector<4x2xf32> to vector<2xf32>
    %12 = vector.shape_cast %11 : vector<2xf32> to vector<1x2xf32>
    %cst_7 = arith.constant dense<0xFF800000> : vector<2xf32>
    %13 = vector.multi_reduction <maximumf>, %4, %cst_7 [0] : vector<4x2xf32> to vector<2xf32>
    %14 = vector.shape_cast %13 : vector<2xf32> to vector<1x2xf32>
    %15 = vector.broadcast %14 : vector<1x2xf32> to vector<4x2xf32>
    %16 = arith.subf %4, %15 : vector<4x2xf32>
    %17 = math.exp %16 : vector<4x2xf32>
    %cst_8 = arith.constant dense<0.000000e+00> : vector<2xf32>
    %18 = vector.multi_reduction <add>, %17, %cst_8 [0] : vector<4x2xf32> to vector<2xf32>
    %19 = vector.shape_cast %18 : vector<2xf32> to vector<1x2xf32>
    %20 = math.log %19 : vector<1x2xf32>
    %21 = arith.addf %14, %20 : vector<1x2xf32>
    %22 = arith.subf %21, %12 : vector<1x2xf32>
    %c2_i32 = arith.constant 2 : i32
    %23 = arith.muli %arg0, %c2_i32 : i32
    %24 = tpu.iota {dimensions = array<i32: 1>} : vector<1x2xi32>
    %25 = vector.broadcast %23 : i32 to vector<1x2xi32>
    %26 = arith.addi %25, %24 : vector<1x2xi32>
    %c2_i32_9 = arith.constant 2 : i32
    %27 = vector.broadcast %c2_i32_9 : i32 to vector<1x2xi32>
    %28 = arith.cmpi slt, %26, %27 : vector<1x2xi32>
    %cst_10 = arith.constant 0.000000e+00 : f32
    %29 = vector.broadcast %cst_10 : f32 to vector<1x2xf32>
    %30 = arith.select %28, %22, %29 : vector<1x2xi1>, vector<1x2xf32>
    %31 = vector.shape_cast %30 : vector<1x2xf32> to vector<1x1x2xf32>
    %cst_11 = arith.constant dense<0.000000e+00> : vector<1xf32>
    %32 = vector.multi_reduction <add>, %31, %cst_11 [1, 2] : vector<1x1x2xf32> to vector<1xf32>
    %33 = vector.shape_cast %32 : vector<1xf32> to vector<1x1x1xf32>
    %34 = vector.extract %33[0, 0, 0] : f32 from vector<1x1x1xf32>
    %35 = vector.broadcast %34 : f32 to vector<1x1x128xf32>
    %c0_12 = arith.constant 0 : index
    %c0_13 = arith.constant 0 : index
    %c0_14 = arith.constant 0 : index
    %36 = vector.load %arg4[%c0_12, %c0_13, %c0_14] : memref<1x1x128xf32, #tpu.memory_space<vmem>>, vector<1x1x128xf32>
    tpu.vector_store %arg4[%c0_12, %c0_13, %c0_14], %35 {strides = array<i32>} : memref<1x1x128xf32, #tpu.memory_space<vmem>>, vector<1x1x128xf32>,
    return
  }
  func.func @transform_0(%arg0: i32) -> (i32, i32) {
    %c0_i32 = arith.constant 0 : i32
    %c0_i32_0 = arith.constant 0 : i32
    return %arg0, %c0_i32 : i32, i32
  }
  func.func @transform_1(%arg0: i32) -> (i32, i32) {
    %c0_i32 = arith.constant 0 : i32
    %c0_i32_0 = arith.constant 0 : i32
    %c0_i32_1 = arith.constant 0 : i32
    return %c0_i32, %c0_i32_0 : i32, i32
  }
  func.func @transform_2(%arg0: i32) -> (i32, i32, i32) {
    %c0_i32 = arith.constant 0 : i32
    %c0_i32_0 = arith.constant 0 : i32
    %c0_i32_1 = arith.constant 0 : i32
    return %arg0, %c0_i32, %c0_i32_0 : i32, i32, i32
  }
  func.func @transform_3(%arg0: i32) -> (i32, i32, i32) {
    %c0_i32 = arith.constant 0 : i32
    %c0_i32_0 = arith.constant 0 : i32
    %c0_i32_1 = arith.constant 0 : i32
    return %arg0, %c0_i32, %c0_i32_0 : i32, i32, i32
  }
}

</mosaic_0001>

<bundles_post_ra>
// kernel: tpu_custom_call.1
= control target key start
LH: loop header
LB: loop body
LE: loop exit
PB: predicated region body
PF: predicated region fallthrough
CT: control target
= control target key end

     0   :  { %8 = vsyncpa [#allocation3], 0  ;;  %s355_s0 = inlined_call_operand.hbm [shape: f32[2,32], index: 0, kind: input, shape index: {}]   ;;  %s356_s1 = inlined_call_operand.hbm [shape: f32[4,32], index: 1, kind: input, shape index: {}]   ;;  %s357_s2 = inlined_call_operand.vmem [shape: s32[1,1,2], index: 2, kind: input, shape index: {}]   ;;  %s358_s3 = inlined_call_operand.hbm [shape: f32[1,1,128], index: 3, kind: output, shape index: {}]  }
   0x1   :  { %9 = vsyncpa [#allocation6], 0 }
   0x2   :  { %10 = vsyncpa [#allocation4], 0  ;;  %s288_s12 = smov [#allocation2]   ;;  %s289_s14 = smov [#allocation5]  }
   0x3   :  { %s17_s13 = sshll.u32 %s288_s12, 4  ;;  %s27_s15 = sshll.u32 %s289_s14, 4  ;;  %s18_s13 = int_to_ptr.vmem [resolvable:$true] %s17_s13  ;;  %s28_s15 = int_to_ptr.vmem [resolvable:$true] %s27_s15 }
   0x4   :  { %s216_s18 = scalar_lea.hbm %s355_s0, 32 }
   0x5   :  { %p217_p0 = scmp.ne.s32.totalorder %s355_s0, %s216_s18  ;;  %p220_p1 = scmp.lt.u32.totalorder %s216_s18, %s355_s0 }
   0x7   :  { %p222_p2 = pnand %p220_p1, %p217_p0 }
   0x9   :  { %225 = shalt.err (!%p222_p2)
}
   0xa   :  { %s226_s23 = scalar_lea.vmem %s18_s13, 32  ;;  %p231_p4 = scmp.lt.s32.totalorder %s18_s13, %s18_s13 }
   0xb   :  { %p227_p3 = scmp.ne.s32.totalorder %s18_s13, %s226_s23  ;;  %p232_p5 = scmp.lt.s32.totalorder %s226_s23, %s226_s23 }
   0xd   :  { %p233_p6 = por %p232_p5, %p231_p4 }
   0xf   :  { %p234_p7 = pnand %p233_p6, %p227_p3 }
  0x11   :  { %237 = shalt.err (!%p234_p7)
}
  0x12   :  { %20 = dma.hbm_to_vmem [thread:$0]  %s355_s0, 32, %s18_s13, [#allocation3]  }
  0x13   :  { %s238_s28 = scalar_lea.hbm %s356_s1, 64 }
  0x14   :  { %p239_p8 = scmp.ne.s32.totalorder %s356_s1, %s238_s28  ;;  %p242_p9 = scmp.lt.u32.totalorder %s238_s28, %s356_s1 }
  0x16   :  { %p244_p10 = pnand %p242_p9, %p239_p8 }
  0x18   :  { %247 = shalt.err (!%p244_p10)
}
  0x19   :  { %s248_s6 = scalar_lea.vmem %s28_s15, 64  ;;  %p253_p12 = scmp.lt.s32.totalorder %s28_s15, %s28_s15 }
  0x1a   :  { %p249_p11 = scmp.ne.s32.totalorder %s28_s15, %s248_s6  ;;  %p254_p13 = scmp.lt.s32.totalorder %s248_s6, %s248_s6 }
  0x1c   :  { %p255_p0 = por %p254_p13, %p253_p12 }
  0x1e   :  { %p256_p1 = pnand %p255_p0, %p249_p11 }
  0x20   :  { %259 = shalt.err (!%p256_p1)
}
  0x21   :  { %30 = dma.hbm_to_vmem [thread:$0]  %s356_s1, 64, %s28_s15, [#allocation6]  }
  0x22   :  { %282 = dma.done.wait [#allocation3], 32  }
  0x23   :  { %283 = vsyncadd [#allocation3], 4294967264 }
  0x24   :  { %284 = dma.done.wait [#allocation6], 64  }
  0x25   :  { %285 = vsyncadd [#allocation6], 4294967232  ;;  %v290_v0 = vmov 0.0   ;;  %vm291_vm0 = vmmov 0   ;;  %vm42_vm1 = vcmask 261120   ;;  %v119_v3 = vlaneseq  ;;  %s292_s1 = smov [#allocation7]  }
  0x26   :  { %200 = vmatprep.subr.mxu0 %v290_v0  ;;  %202 = vmatprep.mubr.msk.f32.mxu0 %vm291_vm0, %v290_v0  ;;  %v39_v1 = vld [vmem:[#allocation2] sm:$0x3]  ;;  %v40_v2 = vld [vmem:[#allocation5] sm:$0xf]  ;;  %vm129_vm3 = vcmask 11264   ;;  %vm165_vm5 = vcmask 8192  }
  0x27   :  { %201 = vmatpush3.xpose.msk.msra.mxu0 %vm42_vm1, %v39_v1  ;;  %v120_v4 = vshrl.u32 %v119_v3, 7  ;;  %v196_v5 = vld [vmem:[%s357_s2] ss:$0 sm:$0xff]  ;;  %v160_v34 = vand.u32 127, %v119_v3  ;;  %s184_s2 = sshll.u32 %s292_s1, 4  ;;  %s185_s2 = int_to_ptr.vmem [resolvable:$true] %s184_s2 }
  0x28   :  { %s260_s11 = scalar_lea.vmem %s185_s2, 16  ;;  %s264_s12 = scalar_lea.vmem %s185_s2, 32 }
  0x29   :  { %vm125_vm2 = vcmp.eq.s32.totalorder %v196_v5, %v120_v4  ;;  %vm163_vm4 = vcmp.lt.s32.totalorder %v160_v34, 2  ;;  %p261_p2 = scmp.ne.s32.totalorder %s185_s2, %s260_s11  ;;  %p265_p3 = scmp.lt.s32.totalorder %s185_s2, %s185_s2 }
  0x2a   :  { %203 = vmatmul.mubr.msk.f32.vlgmr.msra.gmra.mrb[0].mxu0 %vm42_vm1, %v40_v2  ;;  %v197_v6 = vsel %vm125_vm2, 1.0, %v290_v0  ;;  %p266_p4 = scmp.lt.s32.totalorder %s264_s12, %s260_s11 }
  0x2c   :  { %p267_p5 = por %p266_p4, %p265_p3 }
  0x2e   :  { %p268_p6 = pnand %p267_p5, %p261_p2 }
  0xfd   :  { %v115_v7 = vpop.f32.mrb[0].mxu0 }
  0xfe   :  { %v128_v8 = vmul.f32 %v197_v6, %v115_v7  ;;  %v137_v9 = vsel %vm129_vm3, %v115_v7, -inf  ;;  %v204_v10 = vpop.f32.mrb[1].mxu0 }
  0xff   :  { %v138_v11 = vrot.slane %v137_v9, 4 }
 0x100   :  { %v130_v22 = vsel %vm129_vm3, %v128_v8, 0.0 }
 0x101   :  { %v139_v12 = vmax.f32 %v137_v9, %v138_v11  ;;  %v131_v25 = vrot.slane %v130_v22, 4 }
 0x103   :  { %v140_v13 = vrot.slane %v139_v12, 2  ;;  %v132_v28 = vadd.f32 %v131_v25, %v130_v22 }
 0x105   :  { %v141_v14 = vmax.f32 %v139_v12, %v140_v13  ;;  %v133_v30 = vrot.slane %v132_v28, 2 }
 0x107   :  { %v142_v15 = vrot.slane %v141_v14, 1  ;;  %v134_v31 = vadd.f32 %v133_v30, %v132_v28 }
 0x109   :  { %v143_v16 = vmax.f32 %v141_v14, %v142_v15  ;;  %v135_v32 = vrot.slane %v134_v31, 1 }
 0x10b   :  { %v144_v17 = vsub.f32 %v115_v7, %v143_v16  ;;  %v136_v36 = vadd.f32 %v135_v32, %v134_v31 }
 0x10d   :  { %v145_v18 = vmul.f32 1.442695, %v144_v17 }
 0x10f   :  { %212 = vpow2.f32 %v145_v18 }
 0x119   :  { %v213_v19 = vpop.eup %212 }
 0x11a   :  { %v147_v20 = vsel %vm129_vm3, %v213_v19, 0.0 }
 0x11b   :  { %v148_v21 = vrot.slane %v147_v20, 4 }
 0x11d   :  { %v149_v23 = vadd.f32 %v148_v21, %v147_v20 }
 0x11f   :  { %v150_v24 = vrot.slane %v149_v23, 2 }
 0x121   :  { %v151_v26 = vadd.f32 %v150_v24, %v149_v23 }
 0x123   :  { %v152_v27 = vrot.slane %v151_v26, 1 }
 0x125   :  { %v153_v29 = vadd.f32 %v152_v27, %v151_v26 }
 0x127   :  { %214 = vlog2.f32 %v153_v29 }
 0x131   :  { %v215_v33 = vpop.eup %214 }
 0x132   :  { %v155_v35 = vmul.f32 0.6931472, %v215_v33 }
 0x134   :  { %v156_v37 = vadd.f32 %v155_v35, %v143_v16 }
 0x136   :  { %v157_v38 = vsub.f32 %v156_v37, %v136_v36 }
 0x138   :  { %v164_v39 = vsel %vm163_vm4, %v157_v38, 0.0 }
 0x139   :  { %v166_v40 = vsel %vm165_vm5, %v164_v39, 0.0 }
 0x13a   :  { %167 = vadd.xlane.f32.xlu0 %v166_v40 }
 0x1c7   :  { %v168_v41 = vpop.xlane.xlu0 %167 }
 0x1c8   :  { %v169_v42 = vrot.slane %v168_v41, 4 }
 0x1ca   :  { %v170_v43 = vadd.f32 %v169_v42, %v168_v41 }
 0x1cc   :  { %v171_v44 = vrot.slane %v170_v43, 2 }
 0x1ce   :  { %v172_v45 = vadd.f32 %v171_v44, %v170_v43 }
 0x1d0   :  { %v173_v46 = vrot.slane %v172_v45, 1 }
 0x1d2   :  { %v174_v47 = vadd.f32 %v173_v46, %v172_v45 }
 0x1d4   :  { %205 = vpush %v174_v47 }
 0x205   :  { %s206_s10 = spop %205 }
 0x206   :  { %v176_v48 = vstv %s206_s10 }
 0x207   :  { %177 = vst [vmem:[#allocation7] sm:$0x1] %v176_v48 }
 0x208   :  { %271 = shalt.err (!%p268_p6)
}
 0x209   :  { %s272_s15 = scalar_lea.hbm %s358_s3, 16 }
 0x20a   :  { %p273_p7 = scmp.ne.s32.totalorder %s358_s3, %s272_s15  ;;  %p276_p8 = scmp.lt.u32.totalorder %s272_s15, %s358_s3 }
 0x20c   :  { %p278_p9 = pnand %p276_p8, %p273_p7 }
 0x20e   :  { %281 = shalt.err (!%p278_p9)
}
 0x20f   :  { %187 = dma.vmem_to_hbm [thread:$0]  %s185_s2, 16, %s358_s3, [#allocation4]  }
 0x210   :  { %286 = dma.done.wait [#allocation4], 16  }
 0x211   :  { %287 = vsyncadd [#allocation4], 4294967280 }
 0x212   :  { %191 = vsyncpa [#allocation3], 1 }
 0x213   :  { %192 = vsyncpa [#allocation6], 1 }
 0x214   :  { %193 = vsyncpa [#allocation4], 1 }

</bundles_post_ra>
